<compile_context>
chip_gen: v7x
topology: tpu7x:2x2x1
jax: 0.10.0
libtpu: 0.0.40
codegen_flags: <defaults>
</compile_context>

<pallas_src>
import functools
import math

import jax
import jax.numpy as jnp
from jax.experimental import pallas as pl
from jax.experimental.pallas import tpu as pltpu


def _largest_divisor_leq(n, cap):
    cap = max(1, min(cap, n))
    for d in range(cap, 0, -1):
        if n % d == 0:
            return d
    return 1


def _tpu_generation():
    try:
        kind = jax.devices()[0].device_kind.lower()
    except Exception:
        return "unknown"
    if "v5 lite" in kind or "v5e" in kind or "v5litepod" in kind:
        return "v5e"
    if "v6" in kind:
        return "v6e"
    if "v7" in kind or "7x" in kind:
        return "v7x"
    return "unknown"


def _tversky_sums_kernel(p_ref, t_ref, pt_ref, ps_ref, ts_ref, *,
                         s128, chunk, mask_last):
    # Grid axis 1 is the spatial-reduction ("arbitrary") axis: the three
    # (r, 8, 128) output blocks stay resident in VMEM as lane/sublane-dense
    # accumulators.
    j = pl.program_id(1)

    @pl.when(j == 0)
    def _():
        pt_ref[...] = jnp.zeros_like(pt_ref)
        ps_ref[...] = jnp.zeros_like(ps_ref)
        ts_ref[...] = jnp.zeros_like(ts_ref)

    p = p_ref[...].astype(jnp.float32)      # (r, chunk, 128)
    t = t_ref[...].astype(jnp.float32)

    if mask_last:
        # Last spatial block may overrun S128; zero the invalid sublanes.
        # Cheap VPU work, fully hidden behind the HBM DMA (mem-bound kernel).
        idx = jax.lax.broadcasted_iota(jnp.int32, p.shape, 1) + j * chunk
        valid = idx < s128
        p = jnp.where(valid, p, 0.0)
        t = jnp.where(valid, t, 0.0)

    pt = p * t                               # computed once, reused
    rows = p.shape[0]
    shp = (rows, chunk // 8, 8, 128)         # layout-free sublane-dim split
    pt_ref[...] += jnp.sum(pt.reshape(shp), axis=1)   # (rows, 8, 128)
    ps_ref[...] += jnp.sum(p.reshape(shp), axis=1)
    ts_ref[...] += jnp.sum(t.reshape(shp), axis=1)


def _combine(tp, sp, st, N, C):
    tp = tp.reshape(N, C)
    sp = sp.reshape(N, C)
    st = st.reshape(N, C)
    fp = sp - tp             # sum(p * (1 - t))
    fn = st - tp             # sum((1 - p) * t)
    smooth = 1.0
    dice_c = tp / (tp + 0.3 * fp + 0.7 * fn + smooth)   # (N, C)
    dice = jnp.mean(dice_c, axis=1)                     # (N,)
    return jnp.clip(jnp.mean(1.0 - dice), 0.0, 2.0)


@jax.jit
def tversky_loss(pred, target):
    """pred, target: (N, C, D, H, W) arrays. Returns scalar Tversky loss."""
    N, C = pred.shape[0], pred.shape[1]
    S = int(math.prod(pred.shape[2:]))
    NC = N * C

    p2 = pred.reshape(NC, S)
    t2 = target.reshape(NC, S)

    # Sublane multiple required by the input dtypes (8/16/32 for 4/2/1 byte).
    mult = max(8, 32 // pred.dtype.itemsize, 32 // target.dtype.itemsize)

    S128 = S // 128
    lane_tail = S - S128 * 128

    if S128 < mult:
        # Degenerate / tiny spatial extent: a kernel launch is pure overhead.
        p = p2.astype(jnp.float32)
        t = t2.astype(jnp.float32)
        return _combine(jnp.sum(p * t, -1), jnp.sum(p, -1), jnp.sum(t, -1), N, C)

    # ---- per-generation static tile selection -----------------------------
    gen = _tpu_generation()
    if gen in ("v5e", "v6e"):      # single TensorCore, 128 MiB VMEM
        block_rows, chunk_target, vmem_cap = 16, 2048, 64 * 1024 * 1024
    else:                          # v7x (2 TCs, 64 MiB VMEM) or unknown
        block_rows, chunk_target, vmem_cap = 8, 1024, 32 * 1024 * 1024

    # Row blocking: r must divide NC exactly (no padding, no masking on rows).
    # Only on v7x keep >= 2 row blocks so both TensorCores get work.
    r_cap = block_rows
    if gen == "v7x" and NC >= 2:
        r_cap = min(r_cap, NC // 2)
    r = _largest_divisor_leq(NC, r_cap)
    # TODO(synk): for v7x with NC == 1 a spatial core-split (leading parallel
    # grid axis of 2 spatial halves with per-half partial accumulators) would
    # recover the idle core; not implemented here.

    itemsize = pred.dtype.itemsize + target.dtype.itemsize
    chunk = max(mult, (min(chunk_target, S128) // mult) * mult)
    # Keep the double-buffered input tiles well inside the per-gen budget.
    while chunk > mult and 2 * r * chunk * 128 * itemsize > (vmem_cap * 3) // 4:
        chunk = max(mult, ((chunk // 2) // mult) * mult)

    mask_last = (S128 % chunk) != 0
    n_spatial = -(-S128 // chunk)

    tiles_bytes = 2 * r * chunk * 128 * itemsize        # 2x double-buffered
    acc_bytes = 3 * 2 * r * 8 * 128 * 4
    vmem_limit = int(min(vmem_cap,
                         max(16 * 1024 * 1024,
                             (tiles_bytes + acc_bytes) * 3 // 2 + (2 << 20))))

    # ---- spatial tail (S not divisible by 128): tiny JAX reduction --------
    if lane_tail:
        # TODO(synk): the main-region slice below materializes one copy when S
        # is not 128-divisible; the (<128 elem/row) tail is reduced in JAX.
        p_main = p2[:, : S128 * 128]
        t_main = t2[:, : S128 * 128]
        p_tl = p2[:, S128 * 128:].astype(jnp.float32)
        t_tl = t2[:, S128 * 128:].astype(jnp.float32)
        tp_tl = jnp.sum(p_tl * t_tl, axis=-1)
        sp_tl = jnp.sum(p_tl, axis=-1)
        st_tl = jnp.sum(t_tl, axis=-1)
    else:
        p_main, t_main = p2, t2
        tp_tl = sp_tl = st_tl = jnp.zeros((NC,), jnp.float32)

    # Free (contiguous) 3-D view: no jnp.pad, no extra HBM traffic.
    p3 = p_main.reshape(NC, S128, 128)
    t3 = t_main.reshape(NC, S128, 128)

    grid = (NC // r, n_spatial)
    in_spec = pl.BlockSpec((r, chunk, 128), lambda i, j: (i, j, 0))
    out_spec = pl.BlockSpec((r, 8, 128), lambda i, j: (i, 0, 0))
    out_sds = jax.ShapeDtypeStruct((NC, 8, 128), jnp.float32)

    kernel = functools.partial(_tversky_sums_kernel,
                               s128=S128, chunk=chunk, mask_last=mask_last)

    pt_s, p_s, t_s = pl.pallas_call(
        kernel,
        out_shape=(out_sds, out_sds, out_sds),
        grid_spec=pltpu.PrefetchScalarGridSpec(
            num_scalar_prefetch=0,
            grid=grid,
            in_specs=[in_spec, in_spec],
            out_specs=(out_spec, out_spec, out_spec),
        ),
        compiler_params=pltpu.CompilerParams(
            dimension_semantics=("parallel", "arbitrary"),
            vmem_limit_bytes=vmem_limit,
        ),
    )(p3, t3)

    # Final (tiny) cross-sublane/lane reduce + Tversky combination in JAX.
    tp = jnp.sum(pt_s, axis=(1, 2)) + tp_tl
    sp = jnp.sum(p_s, axis=(1, 2)) + sp_tl
    st = jnp.sum(t_s, axis=(1, 2)) + st_tl
    return _combine(tp, sp, st, N, C)


def _tversky_loss_ref(pred, target):
    # Pure-JAX reference mirroring the PyTorch loop.
    smooth = 1.0
    C = pred.shape[1]
    dice = 0.0
    for i in range(C):
        p = pred[:, i]
        t = target[:, i]
        tp = jnp.sum(p * t, axis=(1, 2, 3))
        fp = jnp.sum(p * (1 - t), axis=(1, 2, 3))
        fn = jnp.sum((1 - p) * t, axis=(1, 2, 3))
        dice = dice + tp / (tp + 0.3 * fp + 0.7 * fn + smooth)
    dice = dice / C
    return jnp.clip(jnp.mean(1 - dice), 0.0, 2.0)


if __name__ == "__main__":
    key = jax.random.PRNGKey(0)
    k1, k2 = jax.random.split(key)

    # Small 5-D NCDHW inputs: batch=2, channels=4, D=4, H=16, W=16.
    N, C, D, H, W = 2, 4, 4, 16, 16
    pred = jax.nn.sigmoid(jax.random.normal(k1, (N, C, D, H, W), jnp.float32))
    target = (jax.random.uniform(k2, (N, C, D, H, W)) > 0.5).astype(jnp.float32)

    loss = tversky_loss(pred, target)
    jax.block_until_ready(loss)

    ref = _tversky_loss_ref(pred, target)
    assert jnp.allclose(loss, ref, atol=1e-5, rtol=1e-5), (loss, ref)

    print("KERNEL_OK")
</pallas_src>

<mosaic_0001>
module attributes {stable_mosaic.version = 11 : i64} {
  func.func @_tversky_sums_kernel(%arg0: i32, %arg1: i32, %arg2: memref<8x8x128xf32, #tpu.memory_space<vmem>>, %arg3: memref<8x8x128xf32, #tpu.memory_space<vmem>>, %arg4: memref<8x8x128xf32, #tpu.memory_space<vmem>>, %arg5: memref<8x8x128xf32, #tpu.memory_space<vmem>>, %arg6: memref<8x8x128xf32, #tpu.memory_space<vmem>>) attributes {dimension_semantics = [#tpu.dimension_semantics<parallel>, #tpu.dimension_semantics<arbitrary>], iteration_bounds = array<i64: 1, 1>, scalar_prefetch = 0 : i64, scratch_operands = 0 : i64, tpu.core_type = #tpu.core_type<tc>, window_params = [{transform_indices = @transform_0, window_bounds = array<i64: 8, 8, 128>}, {transform_indices = @transform_1, window_bounds = array<i64: 8, 8, 128>}, {transform_indices = @transform_2, window_bounds = array<i64: 8, 8, 128>}, {transform_indices = @transform_3, window_bounds = array<i64: 8, 8, 128>}, {transform_indices = @transform_4, window_bounds = array<i64: 8, 8, 128>}]} {
    %c0_i32 = arith.constant 0 : i32
    %0 = arith.cmpi eq, %arg1, %c0_i32 : i32
    %1 = arith.extui %0 : i1 to i32
    %c0_i32_0 = arith.constant 0 : i32
    %2 = arith.cmpi ne, %1, %c0_i32_0 : i32
    scf.if %2 {
      %cst_26 = arith.constant 0.000000e+00 : f32
      %21 = vector.broadcast %cst_26 : f32 to vector<8x8x128xf32>
      %c0_27 = arith.constant 0 : index
      %c0_28 = arith.constant 0 : index
      %c0_29 = arith.constant 0 : index
      %22 = vector.load %arg4[%c0_27, %c0_28, %c0_29] : memref<8x8x128xf32, #tpu.memory_space<vmem>>, vector<8x8x128xf32>
      tpu.vector_store %arg4[%c0_27, %c0_28, %c0_29], %21 {strides = array<i32>} : memref<8x8x128xf32, #tpu.memory_space<vmem>>, vector<8x8x128xf32>,
      %cst_30 = arith.constant 0.000000e+00 : f32
      %23 = vector.broadcast %cst_30 : f32 to vector<8x8x128xf32>
      %c0_31 = arith.constant 0 : index
      %c0_32 = arith.constant 0 : index
      %c0_33 = arith.constant 0 : index
      %24 = vector.load %arg5[%c0_31, %c0_32, %c0_33] : memref<8x8x128xf32, #tpu.memory_space<vmem>>, vector<8x8x128xf32>
      tpu.vector_store %arg5[%c0_31, %c0_32, %c0_33], %23 {strides = array<i32>} : memref<8x8x128xf32, #tpu.memory_space<vmem>>, vector<8x8x128xf32>,
      %cst_34 = arith.constant 0.000000e+00 : f32
      %25 = vector.broadcast %cst_34 : f32 to vector<8x8x128xf32>
      %c0_35 = arith.constant 0 : index
      %c0_36 = arith.constant 0 : index
      %c0_37 = arith.constant 0 : index
      %26 = vector.load %arg6[%c0_35, %c0_36, %c0_37] : memref<8x8x128xf32, #tpu.memory_space<vmem>>, vector<8x8x128xf32>
      tpu.vector_store %arg6[%c0_35, %c0_36, %c0_37], %25 {strides = array<i32>} : memref<8x8x128xf32, #tpu.memory_space<vmem>>, vector<8x8x128xf32>,
    } else {
    }
    %c0 = arith.constant 0 : index
    %c0_1 = arith.constant 0 : index
    %c0_2 = arith.constant 0 : index
    %3 = vector.load %arg2[%c0, %c0_1, %c0_2] : memref<8x8x128xf32, #tpu.memory_space<vmem>>, vector<8x8x128xf32>
    %c0_3 = arith.constant 0 : index
    %c0_4 = arith.constant 0 : index
    %c0_5 = arith.constant 0 : index
    %4 = vector.load %arg3[%c0_3, %c0_4, %c0_5] : memref<8x8x128xf32, #tpu.memory_space<vmem>>, vector<8x8x128xf32>
    %5 = arith.mulf %3, %4 : vector<8x8x128xf32>
    %c0_6 = arith.constant 0 : index
    %c0_7 = arith.constant 0 : index
    %c0_8 = arith.constant 0 : index
    %6 = vector.load %arg4[%c0_6, %c0_7, %c0_8] : memref<8x8x128xf32, #tpu.memory_space<vmem>>, vector<8x8x128xf32>
    %7 = vector.shape_cast %5 : vector<8x8x128xf32> to vector<8x1x8x128xf32>
    %cst = arith.constant dense<0.000000e+00> : vector<8x8x128xf32>
    %8 = vector.multi_reduction <add>, %7, %cst [1] : vector<8x1x8x128xf32> to vector<8x8x128xf32>
    %9 = arith.addf %6, %8 : vector<8x8x128xf32>
    %c0_9 = arith.constant 0 : index
    %c0_10 = arith.constant 0 : index
    %c0_11 = arith.constant 0 : index
    %10 = vector.load %arg4[%c0_9, %c0_10, %c0_11] : memref<8x8x128xf32, #tpu.memory_space<vmem>>, vector<8x8x128xf32>
    tpu.vector_store %arg4[%c0_9, %c0_10, %c0_11], %9 {strides = array<i32>} : memref<8x8x128xf32, #tpu.memory_space<vmem>>, vector<8x8x128xf32>,
    %c0_12 = arith.constant 0 : index
    %c0_13 = arith.constant 0 : index
    %c0_14 = arith.constant 0 : index
    %11 = vector.load %arg5[%c0_12, %c0_13, %c0_14] : memref<8x8x128xf32, #tpu.memory_space<vmem>>, vector<8x8x128xf32>
    %12 = vector.shape_cast %3 : vector<8x8x128xf32> to vector<8x1x8x128xf32>
    %cst_15 = arith.constant dense<0.000000e+00> : vector<8x8x128xf32>
    %13 = vector.multi_reduction <add>, %12, %cst_15 [1] : vector<8x1x8x128xf32> to vector<8x8x128xf32>
    %14 = arith.addf %11, %13 : vector<8x8x128xf32>
    %c0_16 = arith.constant 0 : index
    %c0_17 = arith.constant 0 : index
    %c0_18 = arith.constant 0 : index
    %15 = vector.load %arg5[%c0_16, %c0_17, %c0_18] : memref<8x8x128xf32, #tpu.memory_space<vmem>>, vector<8x8x128xf32>
    tpu.vector_store %arg5[%c0_16, %c0_17, %c0_18], %14 {strides = array<i32>} : memref<8x8x128xf32, #tpu.memory_space<vmem>>, vector<8x8x128xf32>,
    %c0_19 = arith.constant 0 : index
    %c0_20 = arith.constant 0 : index
    %c0_21 = arith.constant 0 : index
    %16 = vector.load %arg6[%c0_19, %c0_20, %c0_21] : memref<8x8x128xf32, #tpu.memory_space<vmem>>, vector<8x8x128xf32>
    %17 = vector.shape_cast %4 : vector<8x8x128xf32> to vector<8x1x8x128xf32>
    %cst_22 = arith.constant dense<0.000000e+00> : vector<8x8x128xf32>
    %18 = vector.multi_reduction <add>, %17, %cst_22 [1] : vector<8x1x8x128xf32> to vector<8x8x128xf32>
    %19 = arith.addf %16, %18 : vector<8x8x128xf32>
    %c0_23 = arith.constant 0 : index
    %c0_24 = arith.constant 0 : index
    %c0_25 = arith.constant 0 : index
    %20 = vector.load %arg6[%c0_23, %c0_24, %c0_25] : memref<8x8x128xf32, #tpu.memory_space<vmem>>, vector<8x8x128xf32>
    tpu.vector_store %arg6[%c0_23, %c0_24, %c0_25], %19 {strides = array<i32>} : memref<8x8x128xf32, #tpu.memory_space<vmem>>, vector<8x8x128xf32>,
    return
  }
  func.func @transform_0(%arg0: i32, %arg1: i32) -> (i32, i32, i32) {
    %c0_i32 = arith.constant 0 : i32
    %c0_i32_0 = arith.constant 0 : i32
    return %arg0, %arg1, %c0_i32 : i32, i32, i32
  }
  func.func @transform_1(%arg0: i32, %arg1: i32) -> (i32, i32, i32) {
    %c0_i32 = arith.constant 0 : i32
    %c0_i32_0 = arith.constant 0 : i32
    return %arg0, %arg1, %c0_i32 : i32, i32, i32
  }
  func.func @transform_2(%arg0: i32, %arg1: i32) -> (i32, i32, i32) {
    %c0_i32 = arith.constant 0 : i32
    %c0_i32_0 = arith.constant 0 : i32
    %c0_i32_1 = arith.constant 0 : i32
    return %arg0, %c0_i32, %c0_i32_0 : i32, i32, i32
  }
  func.func @transform_3(%arg0: i32, %arg1: i32) -> (i32, i32, i32) {
    %c0_i32 = arith.constant 0 : i32
    %c0_i32_0 = arith.constant 0 : i32
    %c0_i32_1 = arith.constant 0 : i32
    return %arg0, %c0_i32, %c0_i32_0 : i32, i32, i32
  }
  func.func @transform_4(%arg0: i32, %arg1: i32) -> (i32, i32, i32) {
    %c0_i32 = arith.constant 0 : i32
    %c0_i32_0 = arith.constant 0 : i32
    %c0_i32_1 = arith.constant 0 : i32
    return %arg0, %c0_i32, %c0_i32_0 : i32, i32, i32
  }
}

</mosaic_0001>

<bundles_post_ra>
// kernel: tversky_loss.1
= control target key start
LH: loop header
LB: loop body
LE: loop exit
PB: predicated region body
PF: predicated region fallthrough
CT: control target
= control target key end

     0   :  { %s320_s0 = inlined_call_operand.vmem [shape: f32[8,8,128], index: 0, kind: input, shape index: {}]   ;;  %s321_s1 = inlined_call_operand.vmem [shape: f32[8,8,128], index: 1, kind: input, shape index: {}]   ;;  %s322_s3 = inlined_call_operand.vmem [shape: f32[8,8,128], index: 3, kind: output, shape index: {1}]   ;;  %s323_s4 = inlined_call_operand.vmem [shape: f32[8,8,128], index: 4, kind: output, shape index: {2}]   ;;  %s324_s2 = inlined_call_operand.vmem [shape: f32[8,8,128], index: 2, kind: output, shape index: {0}]  }
   0x1   :  { %v42_v0 = vld [vmem:[%s320_s0] sm:$0xff]  ;;  %v43_v2 = vld [vmem:[%s320_s0 + $0x8] sm:$0xff]  ;;  %v44_v5 = vld [vmem:[%s320_s0 + $0x10] sm:$0xff] }
   0x2   :  { %v50_v1 = vld [vmem:[%s321_s1] sm:$0xff]  ;;  %v51_v4 = vld [vmem:[%s321_s1 + $0x8] sm:$0xff]  ;;  %v52_v6 = vld [vmem:[%s321_s1 + $0x10] sm:$0xff]  ;;  %122 = vst [vmem:[%s322_s3] sm:$0xff] %v42_v0 }
   0x3   :  { %v58_v3 = vmul.f32 %v50_v1, %v42_v0  ;;  %v59_v7 = vmul.f32 %v51_v4, %v43_v2  ;;  %v60_v8 = vmul.f32 %v52_v6, %v44_v5  ;;  %v45_v9 = vld [vmem:[%s320_s0 + $0x18] sm:$0xff]  ;;  %v46_v11 = vld [vmem:[%s320_s0 + $0x20] sm:$0xff]  ;;  %v47_v14 = vld [vmem:[%s320_s0 + $0x28] sm:$0xff]  ;;  %123 = vst [vmem:[%s322_s3 + $0x8] sm:$0xff] %v43_v2 }
   0x4   :  { %v53_v10 = vld [vmem:[%s321_s1 + $0x18] sm:$0xff]  ;;  %v54_v13 = vld [vmem:[%s321_s1 + $0x20] sm:$0xff]  ;;  %v55_v15 = vld [vmem:[%s321_s1 + $0x28] sm:$0xff]  ;;  %154 = vst [vmem:[%s323_s4] sm:$0xff] %v50_v1 }
   0x5   :  { %v61_v12 = vmul.f32 %v53_v10, %v45_v9  ;;  %v62_v16 = vmul.f32 %v54_v13, %v46_v11  ;;  %v63_v17 = vmul.f32 %v55_v15, %v47_v14  ;;  %v48_v18 = vld [vmem:[%s320_s0 + $0x30] sm:$0xff]  ;;  %v49_v20 = vld [vmem:[%s320_s0 + $0x38] sm:$0xff]  ;;  %124 = vst [vmem:[%s322_s3 + $0x10] sm:$0xff] %v44_v5  ;;  %155 = vst [vmem:[%s323_s4 + $0x8] sm:$0xff] %v51_v4 }
   0x6   :  { %v56_v19 = vld [vmem:[%s321_s1 + $0x30] sm:$0xff]  ;;  %90 = vst [vmem:[%s324_s2] sm:$0xff] %v58_v3  ;;  %v57_v22 = vld [vmem:[%s321_s1 + $0x38] sm:$0xff]  ;;  %125 = vst [vmem:[%s322_s3 + $0x18] sm:$0xff] %v45_v9 }
   0x7   :  { %v64_v21 = vmul.f32 %v56_v19, %v48_v18  ;;  %126 = vst [vmem:[%s322_s3 + $0x20] sm:$0xff] %v46_v11  ;;  %91 = vst [vmem:[%s324_s2 + $0x8] sm:$0xff] %v59_v7  ;;  %v65_v23 = vmul.f32 %v57_v22, %v49_v20 }
   0x8   :  { %92 = vst [vmem:[%s324_s2 + $0x10] sm:$0xff] %v60_v8  ;;  %93 = vst [vmem:[%s324_s2 + $0x18] sm:$0xff] %v61_v12 }
   0x9   :  { %127 = vst [vmem:[%s322_s3 + $0x28] sm:$0xff] %v47_v14  ;;  %128 = vst [vmem:[%s322_s3 + $0x30] sm:$0xff] %v48_v18 }
   0xa   :  { %94 = vst [vmem:[%s324_s2 + $0x20] sm:$0xff] %v62_v16  ;;  %95 = vst [vmem:[%s324_s2 + $0x28] sm:$0xff] %v63_v17 }
   0xb   :  { %129 = vst [vmem:[%s322_s3 + $0x38] sm:$0xff] %v49_v20  ;;  %96 = vst [vmem:[%s324_s2 + $0x30] sm:$0xff] %v64_v21 }
   0xc   :  { %156 = vst [vmem:[%s323_s4 + $0x10] sm:$0xff] %v52_v6  ;;  %157 = vst [vmem:[%s323_s4 + $0x18] sm:$0xff] %v53_v10 }
   0xd   :  { %158 = vst [vmem:[%s323_s4 + $0x20] sm:$0xff] %v54_v13  ;;  %97 = vst [vmem:[%s324_s2 + $0x38] sm:$0xff] %v65_v23 }
   0xe   :  { %159 = vst [vmem:[%s323_s4 + $0x28] sm:$0xff] %v55_v15  ;;  %160 = vst [vmem:[%s323_s4 + $0x30] sm:$0xff] %v56_v19 }
   0xf   :  { %161 = vst [vmem:[%s323_s4 + $0x38] sm:$0xff] %v57_v22 }

</bundles_post_ra>
